<compile_context>
chip_gen: v5e
topology: v5e:2x2
jax: 0.10.0
libtpu: 0.0.40
codegen_flags: <defaults>
</compile_context>

<pallas_src>
import functools

import jax
import jax.numpy as jnp
from jax.experimental import pallas as pl
from jax.experimental.pallas import tpu as pltpu

_LANE = 128
# 4096 rows x 128 lanes: 2 MiB (f32) / 1 MiB (bf16) per block; multiple of 32 rows so the
# sublane tiling is native for every dtype (8 for f32, 16 for bf16, 32 for int8/fp8).
_MAX_BLOCK_ROWS = 4096


def _th_shift_relu_kernel(params_ref, x_ref, o_ref, *, modify):
    # params_ref lives in SMEM (scalar prefetch): [0] = shift, [1] = thresh (float32).
    shift = params_ref[0].astype(x_ref.dtype)
    z = x_ref[...] - shift
    if modify:
        # thReLU(z) = z*[0<=z<=thresh] + thresh*[z>thresh]  ==  clip(z, 0, thresh)
        # (identical for all finite inputs; NaN propagates in both formulations)
        thresh = params_ref[1].astype(x_ref.dtype)
        o_ref[...] = jnp.minimum(jnp.maximum(z, 0.0), thresh)
    else:
        o_ref[...] = jnp.maximum(z, 0.0)


def th_shift_relu(x, simulation_length, modify, thresh=0.0):
    """Pallas implementation of th_shift_ReLU.forward (elementwise, memory-bound)."""
    shift = 0.0 if simulation_length == 0 else float(thresh) / (simulation_length * 2)

    orig_shape = x.shape
    flat = x.reshape(-1)
    n = flat.shape[0]

    # Pad only the tail remainder to a lane multiple (usually zero -> no extra HBM traffic).
    pad = (-n) % _LANE
    if pad:
        flat = jnp.pad(flat, (0, pad))
    x2 = flat.reshape(-1, _LANE)
    rows = x2.shape[0]

    # Biggest lane-dense block that fits comfortably in scoped VMEM on v5e/v6e/v7x.
    if rows <= _MAX_BLOCK_ROWS:
        block_rows = rows               # full array in one block (single grid step)
    else:
        block_rows = _MAX_BLOCK_ROWS    # multiple of 32; ragged last block is masked
    num_blocks = pl.cdiv(rows, block_rows)

    # Runtime scalars live in SMEM -> changing thresh / simulation_length does not recompile.
    params = jnp.array([shift, thresh], dtype=jnp.float32)

    kernel = functools.partial(_th_shift_relu_kernel, modify=bool(modify))

    out2 = pl.pallas_call(
        kernel,
        out_shape=jax.ShapeDtypeStruct(x2.shape, x2.dtype),
        grid_spec=pltpu.PrefetchScalarGridSpec(
            num_scalar_prefetch=1,
            grid=(num_blocks,),
            in_specs=[pl.BlockSpec((block_rows, _LANE), lambda i, sref: (i, 0))],
            out_specs=pl.BlockSpec((block_rows, _LANE), lambda i, sref: (i, 0)),
        ),
        compiler_params=pltpu.CompilerParams(
            dimension_semantics=("parallel",),
        ),
    )(params, x2)

    out_flat = out2.reshape(-1)
    if pad:
        out_flat = out_flat[:n]
    return out_flat.reshape(orig_shape)


def _reference(x, simulation_length, modify, thresh):
    """Pure-JAX reference mirroring the PyTorch module (original mask formulation)."""
    shift = 0.0 if simulation_length == 0 else thresh / (simulation_length * 2)
    z = x - shift
    if modify:
        half = thresh / 2.0
        tmp = (jnp.abs(z - half) <= half).astype(z.dtype)
        tmp2 = (z - thresh > 0).astype(z.dtype)
        return z * tmp + tmp2 * thresh
    return jnp.maximum(z, 0.0)


if __name__ == "__main__":
    key = jax.random.PRNGKey(0)

    # NCHW, small shape consistent with the module
    x = jax.random.normal(key, (2, 4, 16, 16), dtype=jnp.float32)

    # Case 1: modify=True (thReLU), simulation_length > 0 (with shift)
    y1 = jax.block_until_ready(th_shift_relu(x, simulation_length=8, modify=True, thresh=1.0))
    r1 = _reference(x, 8, True, 1.0)
    assert y1.shape == x.shape and y1.dtype == x.dtype
    assert jnp.max(jnp.abs(y1 - r1)) < 1e-6

    # Case 2: modify=False (plain ReLU), simulation_length == 0 (no shift)
    y2 = jax.block_until_ready(th_shift_relu(x, simulation_length=0, modify=False, thresh=0.0))
    r2 = _reference(x, 0, False, 0.0)
    assert jnp.max(jnp.abs(y2 - r2)) < 1e-6

    # Case 3: ragged size (exercises lane-remainder padding path)
    key2 = jax.random.PRNGKey(1)
    x3 = jax.random.normal(key2, (2, 3, 7, 5), dtype=jnp.float32)
    y3 = jax.block_until_ready(th_shift_relu(x3, simulation_length=4, modify=True, thresh=0.5))
    r3 = _reference(x3, 4, True, 0.5)
    assert y3.shape == x3.shape
    assert jnp.max(jnp.abs(y3 - r3)) < 1e-6

    print("KERNEL_OK")
</pallas_src>

<mosaic_0001>
module attributes {stable_mosaic.version = 11 : i64} {
  func.func @_th_shift_relu_kernel(%arg0: i32, %arg1: memref<2xf32, #tpu.memory_space<smem>>, %arg2: memref<16x128xf32, #tpu.memory_space<vmem>>, %arg3: memref<16x128xf32, #tpu.memory_space<vmem>>) attributes {dimension_semantics = [#tpu.dimension_semantics<parallel>], iteration_bounds = array<i64: 1>, scalar_prefetch = 1 : i64, scratch_operands = 0 : i64, tpu.core_type = #tpu.core_type<tc>, window_params = [{transform_indices = @transform_0, window_bounds = array<i64: 16, 128>}, {transform_indices = @transform_1, window_bounds = array<i64: 16, 128>}]} {
    %c0 = arith.constant 0 : index
    %0 = memref.load %arg1[%c0] : memref<2xf32, #tpu.memory_space<smem>>
    %c0_0 = arith.constant 0 : index
    %c0_1 = arith.constant 0 : index
    %1 = vector.load %arg2[%c0_0, %c0_1] : memref<16x128xf32, #tpu.memory_space<vmem>>, vector<16x128xf32>
    %2 = vector.broadcast %0 : f32 to vector<16x128xf32>
    %3 = arith.subf %1, %2 : vector<16x128xf32>
    %c1 = arith.constant 1 : index
    %4 = memref.load %arg1[%c1] : memref<2xf32, #tpu.memory_space<smem>>
    %cst = arith.constant 0.000000e+00 : f32
    %5 = vector.broadcast %cst : f32 to vector<16x128xf32>
    %6 = arith.maximumf %3, %5 : vector<16x128xf32>
    %7 = vector.broadcast %4 : f32 to vector<16x128xf32>
    %8 = arith.minimumf %6, %7 : vector<16x128xf32>
    %c0_2 = arith.constant 0 : index
    %c0_3 = arith.constant 0 : index
    %9 = vector.load %arg3[%c0_2, %c0_3] : memref<16x128xf32, #tpu.memory_space<vmem>>, vector<16x128xf32>
    tpu.vector_store %arg3[%c0_2, %c0_3], %8 {strides = array<i32>} : memref<16x128xf32, #tpu.memory_space<vmem>>, vector<16x128xf32>,
    return
  }
  func.func @transform_0(%arg0: i32, %arg1: memref<2xf32, #tpu.memory_space<smem>>) -> (i32, i32) {
    %c0_i32 = arith.constant 0 : i32
    %c0_i32_0 = arith.constant 0 : i32
    return %arg0, %c0_i32 : i32, i32
  }
  func.func @transform_1(%arg0: i32, %arg1: memref<2xf32, #tpu.memory_space<smem>>) -> (i32, i32) {
    %c0_i32 = arith.constant 0 : i32
    %c0_i32_0 = arith.constant 0 : i32
    return %arg0, %c0_i32 : i32, i32
  }
}

</mosaic_0001>

<bundles_post_ra>
// kernel: tpu_custom_call.1
= control target key start
LH: loop header
LB: loop body
LE: loop exit
PB: predicated region body
PF: predicated region fallthrough
CT: control target
= control target key end

     0   :  { %s139_s12 = smov [#allocation3]   ;;  %s168_s0 = inlined_call_operand.hbm [shape: f32[2], index: 0, kind: input, shape index: {}]   ;;  %s169_s1 = inlined_call_operand.hbm [shape: f32[16,128], index: 1, kind: input, shape index: {}]   ;;  %s170_s2 = inlined_call_operand.hbm [shape: f32[16,128], index: 2, kind: output, shape index: {}]  }
   0x1   :  { %s8_s11 = sshll.u32 %s168_s0, 4  ;;  %s9_s11 = int_to_ptr.hbm [resolvable:$true] %s8_s11 }
   0x2   :  { %11 = dma.hbm_to_smem %s9_s11, 16, %s139_s12, [#allocation2] }
   0x3   :  { %133 = dma.done.wait [#allocation2], 16 }
   0x4   :  { %134 = vsyncadd [#allocation2], 4294967280 }
   0x5   :  { %14 = sfence }
   0x6   :  { %15 = vsyncpa [#allocation5], 0 }
   0x7   :  { %16 = vsyncpa [#allocation6], 0  ;;  %s21_s15 = sshll.u32 %s169_s1, 4  ;;  %s140_s16 = smov [#allocation4]   ;;  %s22_s15 = int_to_ptr.hbm [resolvable:$true] %s21_s15 }
   0x8   :  { %s23_s17 = sshll.u32 %s140_s16, 4  ;;  %s141_s18 = smov 128   ;;  %s24_s17 = int_to_ptr.vmem [resolvable:$true] %s23_s17 }
   0x9   :  { %s142_s19 = smov 8  }
   0xa   :  { %29 = dma.hbm_to_vmem [thread:$0]  %s22_s15, 256, %s24_s17, [#allocation5], %s141_s18, %s141_s18, %s142_s19  }
   0xb   :  { %135 = dma.done.wait [#allocation5], 256  }
   0xc   :  { %136 = vsyncadd [#allocation5], 4294967040  ;;  %s34_s0 = sld [smem:[#allocation3]]  ;;  %v35_v0 = vld [vmem:[#allocation4] sm:$0xff]  ;;  %v36_v2 = vld [vmem:[#allocation4 + $0x8] sm:$0xff]  ;;  %s143_s1 = smov [#allocation7]  }
   0xd   :  { %s67_s20 = sld [smem:[#allocation3 + $0x1]]  ;;  %s52_s21 = sshll.u32 %s143_s1, 4  ;;  %s53_s21 = int_to_ptr.vmem [resolvable:$true] %s52_s21 }
   0xe   :  { %s54_s24 = sshll.u32 %s170_s2, 4  ;;  %s55_s24 = int_to_ptr.hbm [resolvable:$true] %s54_s24 }
  0x12   :  { %v37_v1 = vstv %s34_s0 }
  0x13   :  { %v38_v3 = vsub.f32 %v35_v0, %v37_v1  ;;  %v39_v4 = vsub.f32 %v36_v2, %v37_v1  ;;  %v43_v5 = vstv %s67_s20 }
  0x15   :  { %v41_v6 = vmax.f32 %v38_v3, 0.0  ;;  %v42_v7 = vmax.f32 %v39_v4, 0.0 }
  0x17   :  { %v44_v8 = vmin.f32 %v41_v6, %v43_v5  ;;  %v45_v9 = vmin.f32 %v42_v7, %v43_v5 }
  0x19   :  { %46 = vst [vmem:[#allocation7] sm:$0xff] %v44_v8 }
  0x1a   :  { %47 = vst [vmem:[#allocation7 + $0x8] sm:$0xff] %v45_v9 }
  0x1b   :  { %60 = dma.vmem_to_hbm [thread:$0]  %s53_s21, 256, %s55_s24, [#allocation6], %s141_s18, %s141_s18, %s142_s19  }
  0x1c   :  { %137 = dma.done.wait [#allocation6], 256  }
  0x1d   :  { %138 = vsyncadd [#allocation6], 4294967040 }
  0x1e   :  { %65 = vsyncpa [#allocation5], 1 }
  0x1f   :  { %66 = vsyncpa [#allocation6], 1 }

</bundles_post_ra>
